<compile_context>
chip_gen: v6e
topology: v6e:2x2x1
jax: 0.10.0
libtpu: 0.0.40
codegen_flags: <defaults>
</compile_context>

<pallas_src>
import jax
import jax.numpy as jnp
from jax.experimental import pallas as pl
from jax.experimental.pallas import tpu as pltpu


# ----------------------------------------------------------------------------- kernel

def _make_autoencoder_kernel(n_enc_layers: int, n_dec_layers: int, out_dim: int, z_dim: int):
    """Fused MLP kernel in [features, batch] layout; writes packed (X_pred ; Z) block."""
    n_layers = n_enc_layers + n_dec_layers

    def kernel(x_ref, *refs):
        # refs = (w0, b0, w1, b1, ..., w_{L-1}, b_{L-1}, packed_out_ref)
        param_refs = refs[: 2 * n_layers]
        out_ref = refs[2 * n_layers]

        h = x_ref[...]                                   # (d_in, TB), native dtype
        for i in range(n_layers):
            w = param_refs[2 * i][...]                   # (out, in) — resident, no per-step cast
            b = param_refs[2 * i + 1][...]               # (out, 1)
            # Feed the MXU operands in the weight dtype (bf16 stays bf16); accumulate f32.
            lhs = h if h.dtype == w.dtype else h.astype(w.dtype)
            acc = jnp.dot(w, lhs, preferred_element_type=jnp.float32)   # (out, TB) f32
            acc = acc + b                                # lane-broadcast bias (auto-promoted to f32)

            is_last_enc = i == n_enc_layers - 1
            is_last_dec = i == n_layers - 1
            # PyTorch _build_network: ReLU after every Linear except the last of each
            # Sequential (encoder / decoder).
            if not (is_last_enc or is_last_dec):
                acc = jnp.maximum(acc, 0.0)

            if is_last_enc:
                # Latent Z lives in rows [out_dim : out_dim + z_dim) of the packed output.
                out_ref[out_dim:out_dim + z_dim, :] = acc.astype(out_ref.dtype)
            h = acc                                      # keep f32 between layers

        # Reconstruction X_pred lives in rows [0 : out_dim).
        out_ref[0:out_dim, :] = h.astype(out_ref.dtype)

    return kernel


# ----------------------------------------------------------------------------- wrapper

def _round_up(a: int, m: int) -> int:
    return -(-a // m) * m


def basic_autoencoder_forward(x, enc_params, dec_params, *, max_batch_tile: int = 8192):
    """x: [B, D_in]. enc/dec_params: list of (W [out, in], b [out, 1]) (PyTorch layout).

    Returns (X_pred [B, D_out], Z [B, D_z]) in x.dtype; matmuls accumulate in f32.
    """
    n_enc = len(enc_params)
    n_dec = len(dec_params)
    all_params = list(enc_params) + list(dec_params)

    B, d_in = x.shape
    z_dim = enc_params[-1][0].shape[0]
    out_dim = dec_params[-1][0].shape[0]
    packed_dim = out_dim + z_dim

    # ---- batch tile (lane axis). Tiny batches: one tile equal to the (8-aligned) batch.
    # Medium batches: force >=2 tiles so both v7x TensorCores get work. Large batches:
    # cap at max_batch_tile (128-multiple) to amortize the ~0.35 us per-grid-step overhead.
    LANE = 128
    padded_min = _round_up(B, 8)
    if padded_min <= LANE:
        tb = padded_min                                   # single tile == full (tiny) batch
    elif padded_min <= 2 * max_batch_tile:
        tb = _round_up(-(-B // 2), LANE)                  # ~2 tiles -> use both v7x TCs
    else:
        tb = max_batch_tile
    padded_b = _round_up(B, tb)
    num_tiles = padded_b // tb

    # Transpose to [features, batch] (lane-dense) and zero-pad the batch tail.
    x_t = x.T
    if padded_b != B:
        x_t = jnp.pad(x_t, ((0, 0), (0, padded_b - B)))

    kernel = _make_autoencoder_kernel(n_enc, n_dec, out_dim, z_dim)

    # Streamed along the batch (lane) grid axis; double-buffered by the pipeline.
    # TODO(synk): if an xprof trace ever shows exposed input DMA, add
    # pipeline_mode=pl.Buffered(3) on this spec only.
    in_specs = [pl.BlockSpec((d_in, tb), lambda i: (0, i))]
    flat_inputs = [x_t]
    param_bytes = 0
    macs_per_col = 0
    for w, b in all_params:
        # Constant index_map -> same block every step -> VMEM-resident, no re-DMA.
        in_specs.append(pl.BlockSpec(w.shape, lambda i: (0, 0)))
        in_specs.append(pl.BlockSpec(b.shape, lambda i: (0, 0)))
        flat_inputs.append(w)
        flat_inputs.append(b)
        param_bytes += w.size * w.dtype.itemsize + b.size * b.dtype.itemsize
        macs_per_col += w.shape[0] * w.shape[1]

    out_specs = pl.BlockSpec((packed_dim, tb), lambda i: (0, i))
    out_shape = jax.ShapeDtypeStruct((packed_dim, padded_b), x.dtype)

    io_itemsize = jnp.dtype(x.dtype).itemsize
    cost = pl.CostEstimate(
        flops=2 * macs_per_col * padded_b,
        transcendentals=0,
        bytes_accessed=(d_in + packed_dim) * padded_b * io_itemsize + param_bytes,
    )

    packed = pl.pallas_call(
        kernel,
        grid=(num_tiles,),
        in_specs=in_specs,
        out_specs=out_specs,
        out_shape=out_shape,
        compiler_params=pltpu.CompilerParams(
            # Batch tiles are independent -> shard across v7x's 2 TensorCores.
            dimension_semantics=("parallel",),
        ),
        cost_estimate=cost,
    )(*flat_inputs)

    # Split packed output and transpose back to [batch, features]; drop padded tail rows.
    x_pred = packed[:out_dim, :B].T
    z = packed[out_dim:packed_dim, :B].T
    return x_pred, z


# ----------------------------------------------------------------------------- param init

def init_linear_params(key, dims):
    """PyTorch nn.Linear default init: U(-1/sqrt(in), 1/sqrt(in)) for W and b.

    Returns (key, list of (W [out, in], b [out, 1])) — PyTorch-native orientation.
    """
    params = []
    for in_dim, out_dim in zip(dims[:-1], dims[1:]):
        key, kw, kb = jax.random.split(key, 3)
        bound = 1.0 / float(in_dim) ** 0.5
        w = jax.random.uniform(kw, (out_dim, in_dim), jnp.float32, -bound, bound)
        b = jax.random.uniform(kb, (out_dim, 1), jnp.float32, -bound, bound)
        params.append((w, b))
    return key, params


def reference_forward(x, enc_params, dec_params):
    """Pure-JAX reference matching the PyTorch module (and the kernel's mixed precision:
    operands cast to the weight dtype, f32 accumulation, f32 intermediates)."""
    def run(h, params):
        n = len(params)
        for i, (w, b) in enumerate(params):
            lhs = h.astype(w.dtype)
            h = jnp.dot(lhs, w.T, preferred_element_type=jnp.float32) \
                + b.reshape(1, -1).astype(jnp.float32)
            if i != n - 1:
                h = jnp.maximum(h, 0.0)
        return h

    z = run(x, enc_params)
    x_pred = run(z, dec_params)
    return x_pred, z


# ----------------------------------------------------------------------------- main

if __name__ == "__main__":
    # Shapes consistent with the module: BasicAutoEncoder([16, 32, 8], [8, 32, 16])
    encoder_dims = [16, 32, 8]
    decoder_dims = [8, 32, 16]

    key = jax.random.PRNGKey(0)
    key, enc_params = init_linear_params(key, encoder_dims)
    key, dec_params = init_linear_params(key, decoder_dims)

    # ---- Test 1: tiny batch, f32, single tile (block == full array dims).
    batch = 8
    key, kx = jax.random.split(key)
    x = jax.random.normal(kx, (batch, encoder_dims[0]), jnp.float32)

    x_pred, z = basic_autoencoder_forward(x, enc_params, dec_params)
    jax.block_until_ready((x_pred, z))

    x_pred_ref, z_ref = reference_forward(x, enc_params, dec_params)
    assert x_pred.shape == (batch, decoder_dims[-1])
    assert z.shape == (batch, encoder_dims[-1])
    assert jnp.allclose(x_pred, x_pred_ref, atol=1e-5, rtol=1e-5)
    assert jnp.allclose(z, z_ref, atol=1e-5, rtol=1e-5)

    # ---- Test 2: medium batch, default tiling -> 2 pipelined grid steps + tail padding.
    batch2 = 300
    key, kx2 = jax.random.split(key)
    x2 = jax.random.normal(kx2, (batch2, encoder_dims[0]), jnp.float32)

    x_pred2, z2 = basic_autoencoder_forward(x2, enc_params, dec_params)
    jax.block_until_ready((x_pred2, z2))

    x_pred2_ref, z2_ref = reference_forward(x2, enc_params, dec_params)
    assert x_pred2.shape == (batch2, decoder_dims[-1])
    assert z2.shape == (batch2, encoder_dims[-1])
    assert jnp.allclose(x_pred2, x_pred2_ref, atol=1e-5, rtol=1e-5)
    assert jnp.allclose(z2, z2_ref, atol=1e-5, rtol=1e-5)

    # ---- Test 2b: small tile cap -> 3-step grid (exercises multi-tile streaming path).
    x_pred2b, z2b = basic_autoencoder_forward(x2, enc_params, dec_params, max_batch_tile=128)
    jax.block_until_ready((x_pred2b, z2b))
    assert jnp.allclose(x_pred2b, x_pred2_ref, atol=1e-5, rtol=1e-5)
    assert jnp.allclose(z2b, z2_ref, atol=1e-5, rtol=1e-5)

    # ---- Test 3: bf16 I/O + bf16 weights fed straight to the MXU (f32 accumulation).
    x_bf16 = x2.astype(jnp.bfloat16)
    enc_bf16 = [(w.astype(jnp.bfloat16), b.astype(jnp.bfloat16)) for w, b in enc_params]
    dec_bf16 = [(w.astype(jnp.bfloat16), b.astype(jnp.bfloat16)) for w, b in dec_params]

    x_pred_bf, z_bf = basic_autoencoder_forward(x_bf16, enc_bf16, dec_bf16)
    jax.block_until_ready((x_pred_bf, z_bf))
    assert x_pred_bf.dtype == jnp.bfloat16 and z_bf.dtype == jnp.bfloat16

    x_pred_bf_ref, z_bf_ref = reference_forward(x_bf16, enc_bf16, dec_bf16)
    assert jnp.allclose(x_pred_bf.astype(jnp.float32), x_pred_bf_ref, atol=2e-2, rtol=2e-2)
    assert jnp.allclose(z_bf.astype(jnp.float32), z_bf_ref, atol=2e-2, rtol=2e-2)

    print("KERNEL_OK")
</pallas_src>

<mosaic_0001>
module attributes {stable_mosaic.version = 11 : i64} {
  func.func @kernel(%arg0: i32, %arg1: memref<16x8xf32, #tpu.memory_space<vmem>>, %arg2: memref<32x16xf32, #tpu.memory_space<vmem>>, %arg3: memref<32x1xf32, #tpu.memory_space<vmem>>, %arg4: memref<8x32xf32, #tpu.memory_space<vmem>>, %arg5: memref<8x1xf32, #tpu.memory_space<vmem>>, %arg6: memref<32x8xf32, #tpu.memory_space<vmem>>, %arg7: memref<32x1xf32, #tpu.memory_space<vmem>>, %arg8: memref<16x32xf32, #tpu.memory_space<vmem>>, %arg9: memref<16x1xf32, #tpu.memory_space<vmem>>, %arg10: memref<24x8xf32, #tpu.memory_space<vmem>>) attributes {dimension_semantics = [#tpu.dimension_semantics<parallel>], iteration_bounds = array<i64: 1>, scalar_prefetch = 0 : i64, scratch_operands = 0 : i64, tpu.core_type = #tpu.core_type<tc>, window_params = [{transform_indices = @transform_0, window_bounds = array<i64: 16, 8>}, {pipeline_mode = #tpu.pipeline_mode<synchronous>, transform_indices = @transform_1, window_bounds = array<i64: 32, 16>}, {pipeline_mode = #tpu.pipeline_mode<synchronous>, transform_indices = @transform_2, window_bounds = array<i64: 32, 1>}, {pipeline_mode = #tpu.pipeline_mode<synchronous>, transform_indices = @transform_3, window_bounds = array<i64: 8, 32>}, {pipeline_mode = #tpu.pipeline_mode<synchronous>, transform_indices = @transform_4, window_bounds = array<i64: 8, 1>}, {pipeline_mode = #tpu.pipeline_mode<synchronous>, transform_indices = @transform_5, window_bounds = array<i64: 32, 8>}, {pipeline_mode = #tpu.pipeline_mode<synchronous>, transform_indices = @transform_6, window_bounds = array<i64: 32, 1>}, {pipeline_mode = #tpu.pipeline_mode<synchronous>, transform_indices = @transform_7, window_bounds = array<i64: 16, 32>}, {pipeline_mode = #tpu.pipeline_mode<synchronous>, transform_indices = @transform_8, window_bounds = array<i64: 16, 1>}, {transform_indices = @transform_9, window_bounds = array<i64: 24, 8>}]} {
    %c0 = arith.constant 0 : index
    %c0_0 = arith.constant 0 : index
    %0 = vector.load %arg1[%c0, %c0_0] : memref<16x8xf32, #tpu.memory_space<vmem>>, vector<16x8xf32>
    %c0_1 = arith.constant 0 : index
    %c0_2 = arith.constant 0 : index
    %1 = vector.load %arg2[%c0_1, %c0_2] : memref<32x16xf32, #tpu.memory_space<vmem>>, vector<32x16xf32>
    %c0_3 = arith.constant 0 : index
    %c0_4 = arith.constant 0 : index
    %2 = vector.load %arg3[%c0_3, %c0_4] : memref<32x1xf32, #tpu.memory_space<vmem>>, vector<32x1xf32>
    %cst = arith.constant dense<0.000000e+00> : vector<32x8xf32>
    %3 = tpu.matmul %1, %0, %cst {dimension_numbers = #tpu.dot_dimension_numbers<[1], [0], [0], [1], [0, 0, 1, 1], [], []>} : vector<32x16xf32>, vector<16x8xf32>, vector<32x8xf32> -> vector<32x8xf32>
    %4 = vector.broadcast %2 : vector<32x1xf32> to vector<32x8xf32>
    %5 = arith.addf %3, %4 : vector<32x8xf32>
    %cst_5 = arith.constant 0.000000e+00 : f32
    %6 = vector.broadcast %cst_5 : f32 to vector<32x8xf32>
    %7 = arith.maximumf %5, %6 : vector<32x8xf32>
    %c0_6 = arith.constant 0 : index
    %c0_7 = arith.constant 0 : index
    %8 = vector.load %arg4[%c0_6, %c0_7] : memref<8x32xf32, #tpu.memory_space<vmem>>, vector<8x32xf32>
    %c0_8 = arith.constant 0 : index
    %c0_9 = arith.constant 0 : index
    %9 = vector.load %arg5[%c0_8, %c0_9] : memref<8x1xf32, #tpu.memory_space<vmem>>, vector<8x1xf32>
    %cst_10 = arith.constant dense<0.000000e+00> : vector<8x8xf32>
    %10 = tpu.matmul %8, %7, %cst_10 {dimension_numbers = #tpu.dot_dimension_numbers<[1], [0], [0], [1], [0, 0, 1, 1], [], []>} : vector<8x32xf32>, vector<32x8xf32>, vector<8x8xf32> -> vector<8x8xf32>
    %11 = vector.broadcast %9 : vector<8x1xf32> to vector<8x8xf32>
    %12 = arith.addf %10, %11 : vector<8x8xf32>
    %c16 = arith.constant 16 : index
    %c0_11 = arith.constant 0 : index
    %13 = vector.load %arg10[%c16, %c0_11] : memref<24x8xf32, #tpu.memory_space<vmem>>, vector<8x8xf32>
    tpu.vector_store %arg10[%c16, %c0_11], %12 {strides = array<i32>} : memref<24x8xf32, #tpu.memory_space<vmem>>, vector<8x8xf32>,
    %c0_12 = arith.constant 0 : index
    %c0_13 = arith.constant 0 : index
    %14 = vector.load %arg6[%c0_12, %c0_13] : memref<32x8xf32, #tpu.memory_space<vmem>>, vector<32x8xf32>
    %c0_14 = arith.constant 0 : index
    %c0_15 = arith.constant 0 : index
    %15 = vector.load %arg7[%c0_14, %c0_15] : memref<32x1xf32, #tpu.memory_space<vmem>>, vector<32x1xf32>
    %cst_16 = arith.constant dense<0.000000e+00> : vector<32x8xf32>
    %16 = tpu.matmul %14, %12, %cst_16 {dimension_numbers = #tpu.dot_dimension_numbers<[1], [0], [0], [1], [0, 0, 1, 1], [], []>} : vector<32x8xf32>, vector<8x8xf32>, vector<32x8xf32> -> vector<32x8xf32>
    %17 = vector.broadcast %15 : vector<32x1xf32> to vector<32x8xf32>
    %18 = arith.addf %16, %17 : vector<32x8xf32>
    %cst_17 = arith.constant 0.000000e+00 : f32
    %19 = vector.broadcast %cst_17 : f32 to vector<32x8xf32>
    %20 = arith.maximumf %18, %19 : vector<32x8xf32>
    %c0_18 = arith.constant 0 : index
    %c0_19 = arith.constant 0 : index
    %21 = vector.load %arg8[%c0_18, %c0_19] : memref<16x32xf32, #tpu.memory_space<vmem>>, vector<16x32xf32>
    %c0_20 = arith.constant 0 : index
    %c0_21 = arith.constant 0 : index
    %22 = vector.load %arg9[%c0_20, %c0_21] : memref<16x1xf32, #tpu.memory_space<vmem>>, vector<16x1xf32>
    %cst_22 = arith.constant dense<0.000000e+00> : vector<16x8xf32>
    %23 = tpu.matmul %21, %20, %cst_22 {dimension_numbers = #tpu.dot_dimension_numbers<[1], [0], [0], [1], [0, 0, 1, 1], [], []>} : vector<16x32xf32>, vector<32x8xf32>, vector<16x8xf32> -> vector<16x8xf32>
    %24 = vector.broadcast %22 : vector<16x1xf32> to vector<16x8xf32>
    %25 = arith.addf %23, %24 : vector<16x8xf32>
    %c0_23 = arith.constant 0 : index
    %c0_24 = arith.constant 0 : index
    %26 = vector.load %arg10[%c0_23, %c0_24] : memref<24x8xf32, #tpu.memory_space<vmem>>, vector<16x8xf32>
    tpu.vector_store %arg10[%c0_23, %c0_24], %25 {strides = array<i32>} : memref<24x8xf32, #tpu.memory_space<vmem>>, vector<16x8xf32>,
    return
  }
  func.func @transform_0(%arg0: i32) -> (i32, i32) {
    %c0_i32 = arith.constant 0 : i32
    %c0_i32_0 = arith.constant 0 : i32
    return %c0_i32, %arg0 : i32, i32
  }
  func.func @transform_1(%arg0: i32) -> (i32, i32) {
    %c0_i32 = arith.constant 0 : i32
    %c0_i32_0 = arith.constant 0 : i32
    %c0_i32_1 = arith.constant 0 : i32
    return %c0_i32, %c0_i32_0 : i32, i32
  }
  func.func @transform_2(%arg0: i32) -> (i32, i32) {
    %c0_i32 = arith.constant 0 : i32
    %c0_i32_0 = arith.constant 0 : i32
    %c0_i32_1 = arith.constant 0 : i32
    return %c0_i32, %c0_i32_0 : i32, i32
  }
  func.func @transform_3(%arg0: i32) -> (i32, i32) {
    %c0_i32 = arith.constant 0 : i32
    %c0_i32_0 = arith.constant 0 : i32
    %c0_i32_1 = arith.constant 0 : i32
    return %c0_i32, %c0_i32_0 : i32, i32
  }
  func.func @transform_4(%arg0: i32) -> (i32, i32) {
    %c0_i32 = arith.constant 0 : i32
    %c0_i32_0 = arith.constant 0 : i32
    %c0_i32_1 = arith.constant 0 : i32
    return %c0_i32, %c0_i32_0 : i32, i32
  }
  func.func @transform_5(%arg0: i32) -> (i32, i32) {
    %c0_i32 = arith.constant 0 : i32
    %c0_i32_0 = arith.constant 0 : i32
    %c0_i32_1 = arith.constant 0 : i32
    return %c0_i32, %c0_i32_0 : i32, i32
  }
  func.func @transform_6(%arg0: i32) -> (i32, i32) {
    %c0_i32 = arith.constant 0 : i32
    %c0_i32_0 = arith.constant 0 : i32
    %c0_i32_1 = arith.constant 0 : i32
    return %c0_i32, %c0_i32_0 : i32, i32
  }
  func.func @transform_7(%arg0: i32) -> (i32, i32) {
    %c0_i32 = arith.constant 0 : i32
    %c0_i32_0 = arith.constant 0 : i32
    %c0_i32_1 = arith.constant 0 : i32
    return %c0_i32, %c0_i32_0 : i32, i32
  }
  func.func @transform_8(%arg0: i32) -> (i32, i32) {
    %c0_i32 = arith.constant 0 : i32
    %c0_i32_0 = arith.constant 0 : i32
    %c0_i32_1 = arith.constant 0 : i32
    return %c0_i32, %c0_i32_0 : i32, i32
  }
  func.func @transform_9(%arg0: i32) -> (i32, i32) {
    %c0_i32 = arith.constant 0 : i32
    %c0_i32_0 = arith.constant 0 : i32
    return %c0_i32, %arg0 : i32, i32
  }
}

</mosaic_0001>

<bundles_post_ra>
// kernel: tpu_custom_call.1
= control target key start
LH: loop header
LB: loop body
LE: loop exit
PB: predicated region body
PF: predicated region fallthrough
CT: control target
= control target key end

     0   :  { %vm62_vm0 = vcmask 130048   ;;  %v555_v3 = vmov 0   ;;  %v556_v18 = vmov 0.0   ;;  %vm557_vm1 = vmmov 0   ;;  %s703_s0 = inlined_call_operand.vmem [shape: f32[16,8], index: 0, kind: input, shape index: {}]   ;;  %s704_s1 = inlined_call_operand.vmem [shape: f32[32,16], index: 1, kind: input, shape index: {}]   ;;  %s705_s2 = inlined_call_operand.vmem [shape: f32[32,1], index: 2, kind: input, shape index: {}]   ;;  %s706_s4 = inlined_call_operand.vmem [shape: f32[8,1], index: 4, kind: input, shape index: {}]   ;;  %s707_s6 = inlined_call_operand.vmem [shape: f32[32,1], index: 6, kind: input, shape index: {}]   ;;  %s708_s8 = inlined_call_operand.vmem [shape: f32[16,1], index: 8, kind: input, shape index: {}]   ;;  %s709_s3 = inlined_call_operand.vmem [shape: f32[8,32], index: 3, kind: input, shape index: {}]   ;;  %s710_s5 = inlined_call_operand.vmem [shape: f32[32,8], index: 5, kind: input, shape index: {}]   ;;  %s711_s9 = inlined_call_operand.vmem [shape: f32[24,8], index: 9, kind: output, shape index: {}]   ;;  %s712_s7 = inlined_call_operand.vmem [shape: f32[16,32], index: 7, kind: input, shape index: {}]  }
   0x1   :  { %v33_v0 = vld [vmem:[%s703_s0 + $0x8] sm:$0xff]  ;;  %v32_v1 = vld [vmem:[%s703_s0] sm:$0xff]  ;;  %553 = vset.pattern.permute.xlu0 %v555_v3  ;;  %554 = vset.pattern.permute.xlu1 %v555_v3  ;;  %v41_v5 = vld [vmem:[%s705_s2 + $0x18] sm:$0xff]  ;;  %vm171_vm2 = vcmask 261120   ;;  %vm245_vm3 = vcmask 64512  }
   0x2   :  { %v34_v2 = vld [vmem:[%s704_s1] sm:$0xff]  ;;  %510 = vmatprep.subr.mxu0 %v33_v0  ;;  %v35_v4 = vld [vmem:[%s704_s1 + $0x8] sm:$0xff]  ;;  %v36_v6 = vld [vmem:[%s704_s1 + $0x10] sm:$0xff]  ;;  %59 = vperm.xlu0 %553, %v41_v5  }
   0x3   :  { %514 = vmatprep.mubr.msk.f32.mxu0 %vm62_vm0, %v34_v2  ;;  %511 = vmatpush3.msra.mxu0 %v33_v0  ;;  %v39_v7 = vld [vmem:[%s705_s2 + $0x8] sm:$0xff]  ;;  %v40_v8 = vld [vmem:[%s705_s2 + $0x10] sm:$0xff]  ;;  %v38_v9 = vld [vmem:[%s705_s2] sm:$0xff] }
   0x4   :  { %512 = vmatprep.subr.mxu0 %v32_v1  ;;  %49 = vperm.xlu1 %554, %v39_v7   ;;  %v37_v10 = vld [vmem:[%s704_s1 + $0x18] sm:$0xff]  ;;  %v165_v11 = vld [vmem:[%s706_s4] sm:$0xff]  ;;  %v253_v13 = vld [vmem:[%s707_s6 + $0x10] sm:$0xff] }
   0x5   :  { %513 = vmatpush3.msra.mxu0 %v32_v1  ;;  %v254_v12 = vld [vmem:[%s707_s6 + $0x18] sm:$0xff]  ;;  %v252_v14 = vld [vmem:[%s707_s6 + $0x8] sm:$0xff]  ;;  %v251_v15 = vld [vmem:[%s707_s6] sm:$0xff]  ;;  %520 = vmatprep.subr.mxu1 %v556_v18 }
   0x6   :  { %515 = vmatmul.mubr.msk.f32.vlgmr.msra.gmra.mxu0 %vm62_vm0, %v35_v4  ;;  %54 = vperm.xlu0 %553, %v40_v8   ;;  %v378_v16 = vld [vmem:[%s708_s8] sm:$0xff]  ;;  %v379_v17 = vld [vmem:[%s708_s8 + $0x8] sm:$0xff]  ;;  %v249_v42 = vld [vmem:[%s710_s5 + $0x10] sm:$0xff] }
   0x7   :  { %517 = vmatprep.mubr.msk.f32.mxu0 %vm62_vm0, %v36_v6  ;;  %528 = vmatprep.mubr.msk.f32.mxu1 %vm557_vm1, %v556_v18  ;;  %v164_v35 = vld [vmem:[%s709_s3] sm:$0xff]  ;;  %v248_v41 = vld [vmem:[%s710_s5 + $0x8] sm:$0xff]  ;;  %v250_v43 = vld [vmem:[%s710_s5 + $0x18] sm:$0xff] }
   0x8   :  { %44 = vperm.xlu1 %554, %v38_v9   ;;  %v247_v36 = vld [vmem:[%s710_s5] sm:$0xff]  ;;  %v377_v61 = vld [vmem:[%s712_s7 + $0x8] sm:$0xff] }
   0x9   :  { %v376_v44 = vld [vmem:[%s712_s7] sm:$0xff] }
   0xa   :  { %518 = vmatmul.mubr.msk.f32.gmra.mxu0 %vm62_vm0, %v37_v10  ;;  %168 = vperm.xlu0 %553, %v165_v11  }
   0xb   :  { %533 = vmatprep.mubr.msk.f32.mxu0 %vm245_vm3, %v247_v36 }
   0xc   :  { %272 = vperm.xlu1 %554, %v254_v12  }
   0xe   :  { %267 = vperm.xlu0 %553, %v253_v13  }
  0x10   :  { %262 = vperm.xlu1 %554, %v252_v14  }
  0x12   :  { %257 = vperm.xlu0 %553, %v251_v15  }
  0x14   :  { %382 = vperm.xlu1 %554, %v378_v16  }
  0x16   :  { %387 = vperm.xlu0 %553, %v379_v17  }
  0x7d   :  { %v60_v19 = vpop.permute.xlu0 %59 }
  0x7f   :  { %v50_v21 = vpop.permute.xlu1 %49 }
  0x81   :  { %v55_v25 = vpop.permute.xlu0 %54 }
  0x83   :  { %v45_v30 = vpop.permute.xlu1 %44 }
  0x85   :  { %v169_v37 = vpop.permute.xlu0 %168 }
  0x87   :  { %v273_v45 = vpop.permute.xlu1 %272 }
  0x89   :  { %v268_v47 = vpop.permute.xlu0 %267 }
  0x8b   :  { %v263_v51 = vpop.permute.xlu1 %262 }
  0x8d   :  { %v258_v56 = vpop.permute.xlu0 %257 }
  0x8f   :  { %v383_v1 = vpop.permute.xlu1 %382 }
  0x91   :  { %v388_v62 = vpop.permute.xlu0 %387 }
  0xc6   :  { %v516_v20 = vpop.f32.mrf.mxu0 }
  0xc7   :  { %v147_v27 = vadd.f32 %v516_v20, %v50_v21 }
  0xc8   :  { %v141_v22 = vpop.f32.mrf.mxu0 }
  0xc9   :  { %v142_v31 = vadd.f32 %v141_v22, %v45_v30  ;;  %v161_v33 = vmax.f32 %v147_v27, 0.0 }
  0xca   :  { %v519_v23 = vpop.f32.mrf.mxu0 }
  0xcb   :  { %v157_v24 = vadd.f32 %v519_v23, %v60_v19  ;;  %v160_v34 = vmax.f32 %v142_v31, 0.0 }
  0xcc   :  { %v151_v26 = vpop.f32.mrf.mxu0 }
  0xcd   :  { %v163_v28 = vmax.f32 %v157_v24, 0.0  ;;  %v152_v29 = vadd.f32 %v151_v26, %v55_v25 }
  0xcf   :  { %v162_v32 = vmax.f32 %v152_v29, 0.0  ;;  %521 = vmatpush3.msra.mxu1 %v163_v28 }
  0xd0   :  { %522 = vmatprep.subr.mxu1 %v556_v18 }
  0xd1   :  { %523 = vmatpush3.msra.mxu1 %v162_v32 }
  0xd2   :  { %524 = vmatprep.subr.mxu1 %v556_v18 }
  0xd3   :  { %525 = vmatpush3.msra.mxu1 %v161_v33 }
  0xd4   :  { %526 = vmatprep.subr.mxu1 %v556_v18 }
  0xd5   :  { %527 = vmatpush3.msra.mxu1 %v160_v34 }
  0xd6   :  { %529 = vmatmul.mubr.msk.f32.vlgmr.msra.gmra.mxu1 %vm171_vm2, %v164_v35 }
  0xd7   :  { %547 = vmatprep.mubr.msk.f32.mxu1 %vm171_vm2, %v376_v44 }
 0x196   :  { %v241_v38 = vpop.f32.mrf.mxu1 }
 0x197   :  { %v242_v39 = vadd.f32 %v241_v38, %v169_v37 }
 0x198   :  { %v530_v40 = vpop.f32.mrf.mxu1 }
 0x199   :  { %246 = vst.msk [vmem:[%s711_s9 + $0x10] sm:$0xff] %vm245_vm3, %v242_v39  ;;  %531 = vmatprep.subr.mxu0 %v242_v39 }
 0x19a   :  { %532 = vmatpush3.msra.mxu0 %v242_v39 }
 0x19b   :  { %534 = vmatmul.mubr.msk.f32.vlgmr.msra.gmra.mxu0 %vm245_vm3, %v248_v41 }
 0x19c   :  { %536 = vmatprep.mubr.msk.f32.mxu0 %vm245_vm3, %v249_v42 }
 0x19f   :  { %537 = vmatmul.mubr.msk.f32.gmra.mxu0 %vm245_vm3, %v250_v43 }
 0x25b   :  { %v535_v46 = vpop.f32.mrf.mxu0 }
 0x25c   :  { %v359_v53 = vadd.f32 %v535_v46, %v263_v51 }
 0x25d   :  { %v353_v48 = vpop.f32.mrf.mxu0 }
 0x25e   :  { %v354_v57 = vadd.f32 %v353_v48, %v258_v56  ;;  %v373_v59 = vmax.f32 %v359_v53, 0.0 }
 0x25f   :  { %v538_v49 = vpop.f32.mrf.mxu0 }
 0x260   :  { %v369_v50 = vadd.f32 %v538_v49, %v273_v45  ;;  %v372_v60 = vmax.f32 %v354_v57, 0.0 }
 0x261   :  { %v363_v52 = vpop.f32.mrf.mxu0 }
 0x262   :  { %v375_v54 = vmax.f32 %v369_v50, 0.0  ;;  %v364_v55 = vadd.f32 %v363_v52, %v268_v47 }
 0x264   :  { %v374_v58 = vmax.f32 %v364_v55, 0.0  ;;  %539 = vmatprep.subr.mxu1 %v375_v54 }
 0x265   :  { %540 = vmatpush3.msra.mxu1 %v375_v54 }
 0x266   :  { %541 = vmatprep.subr.mxu1 %v374_v58 }
 0x267   :  { %542 = vmatpush3.msra.mxu1 %v374_v58 }
 0x268   :  { %543 = vmatprep.subr.mxu1 %v373_v59 }
 0x269   :  { %544 = vmatpush3.msra.mxu1 %v373_v59 }
 0x26a   :  { %545 = vmatprep.subr.mxu1 %v372_v60 }
 0x26b   :  { %546 = vmatpush3.msra.mxu1 %v372_v60 }
 0x26c   :  { %548 = vmatmul.mubr.msk.f32.vlgmr.msra.gmra.mxu1 %vm171_vm2, %v377_v61 }
 0x32c   :  { %v549_v63 = vpop.f32.mrf.mxu1 }
 0x32d   :  { %v468_v0 = vadd.f32 %v549_v63, %v388_v62 }
 0x32e   :  { %v462_v2 = vpop.f32.mrf.mxu1 }
 0x32f   :  { %472 = vst.msk [vmem:[%s711_s9 + $0x8] sm:$0xff] %vm245_vm3, %v468_v0  ;;  %v463_v3 = vadd.f32 %v462_v2, %v383_v1 }
 0x331   :  { %471 = vst.msk [vmem:[%s711_s9] sm:$0xff] %vm245_vm3, %v463_v3 }

</bundles_post_ra>
